<compile_context>
chip_gen: v7x
topology: tpu7x:2x2x1
jax: 0.10.0
libtpu: 0.0.40
codegen_flags: <defaults>
</compile_context>

<pallas_src>
import math
from functools import lru_cache

import numpy as np

import jax
import jax.numpy as jnp
from jax.experimental import pallas as pl
from jax.experimental.pallas import tpu as pltpu


def _round_up(a: int, b: int) -> int:
    return ((a + b - 1) // b) * b


@lru_cache(maxsize=None)
def _dft_power_basis(L: int, Lp: int, Kp: int, dtype_name: str):
    """Fused [cos | sin] DFT basis, (Lp, 2*Kp), with sqrt(2/L) folded in.

    Built on host in float64; the phase (n*k) mod L is computed in exact
    integer arithmetic so cos/sin never see large arguments.
    """
    K = L // 2
    n = np.arange(L, dtype=np.int64)[:, None]
    k = np.arange(K, dtype=np.int64)[None, :]
    phase = (n * k) % L
    ang = (2.0 * np.pi / L) * phase.astype(np.float64)
    scale = math.sqrt(2.0 / L)
    w = np.zeros((Lp, 2 * Kp), dtype=np.float64)
    w[:L, :K] = np.cos(ang) * scale
    w[:L, Kp:Kp + K] = np.sin(ang) * scale   # sign of Im is irrelevant (squared)
    return jnp.asarray(w).astype(dtype_name)


def dft_power_kernel(x_ref, w_ref, o_ref):
    # x_ref: (tm, Lp)        input rows (original dtype, streamed from HBM)
    # w_ref: (Lp, 2*Kp)      fused [cos | sin] basis, whole-array VMEM-resident
    # o_ref: (tm, Kp)        float32 periodogram rows
    kp = o_ref.shape[-1]
    x = x_ref[...].astype(w_ref.dtype)                 # cast in-kernel (bf16 path)
    y = jnp.dot(x, w_ref[...], preferred_element_type=jnp.float32)   # (tm, 2*Kp)
    re = y[:, :kp]
    im = y[:, kp:]
    o_ref[...] = (re * re + im * im).astype(o_ref.dtype)


def fft_layer(x, *, tm=256, basis_dtype="bfloat16"):
    """x: (B, C, L) -> (B, C, L//2) one-sided power spectrum, 2/L * |FFT|^2."""
    B, C, L = x.shape
    K = L // 2
    M = B * C

    # Lane-dense padding: output last dim and contraction dim -> multiples of 128.
    Lp = _round_up(L, 128)
    Kp = _round_up(max(K, 1), 128)

    w = _dft_power_basis(L, Lp, Kp, basis_dtype)

    xf = x.reshape(M, L)

    # Row-tile: multiple of 8 (sublane), capped by M; when M allows it, keep the
    # grid >= 2 steps so the "parallel" axis can shard across v7x's two TCs.
    tm = max(8, min(tm, _round_up(M, 8)))
    if _round_up(M, 8) >= 16:
        tm = min(tm, _round_up(-(-M // 2), 8))
    Mp = _round_up(M, tm)

    pad_m, pad_l = Mp - M, Lp - L
    if pad_m or pad_l:
        xf = jnp.pad(xf, ((0, pad_m), (0, pad_l)))

    x_bpe = xf.dtype.itemsize
    w_bpe = jnp.dtype(basis_dtype).itemsize
    vmem_need = (
        Lp * 2 * Kp * w_bpe          # basis, single VMEM copy
        + 2 * tm * Lp * x_bpe        # double-buffered x tiles
        + 2 * tm * Kp * 4            # double-buffered output tiles
        + tm * 2 * Kp * 4            # f32 matmul result intermediate
    )
    vmem_limit = int(min(vmem_need * 1.5 + (4 << 20), 127 << 20))

    cost = pl.CostEstimate(
        flops=2 * Mp * Lp * (2 * Kp) + 3 * Mp * Kp,
        bytes_accessed=Mp * Lp * x_bpe + Lp * 2 * Kp * w_bpe + Mp * Kp * 4,
        transcendentals=0,
    )

    out = pl.pallas_call(
        dft_power_kernel,
        out_shape=jax.ShapeDtypeStruct((Mp, Kp), jnp.float32),
        grid_spec=pltpu.PrefetchScalarGridSpec(
            num_scalar_prefetch=0,
            grid=(Mp // tm,),
            in_specs=[
                pl.BlockSpec((tm, Lp), lambda i: (i, 0)),            # stream x rows
                pl.BlockSpec(memory_space=pltpu.MemorySpace.VMEM),   # resident basis
            ],
            out_specs=pl.BlockSpec((tm, Kp), lambda i: (i, 0)),
        ),
        compiler_params=pltpu.CompilerParams(
            dimension_semantics=("parallel",),
            vmem_limit_bytes=vmem_limit,
        ),
        cost_estimate=cost,
    )(xf, w)

    return out[:M, :K].reshape(B, C, K)


def reference(x):
    L = x.shape[-1]
    X = jnp.fft.fft(x.astype(jnp.float32), axis=-1)
    return (2.0 / L) * jnp.abs(X[..., : L // 2]) ** 2


if __name__ == "__main__":
    B, C, L = 2, 4, 16

    key = jax.random.PRNGKey(0)
    x = jax.random.normal(key, (B, C, L), dtype=jnp.float32)

    ref = reference(x)

    # Fast path: bf16 MXU matmuls (native rate on v5e/v6e/v7x).
    out_bf16 = fft_layer(x, basis_dtype="bfloat16")
    jax.block_until_ready(out_bf16)
    assert out_bf16.shape == (B, C, L // 2), f"bad shape {out_bf16.shape}"
    assert jnp.allclose(out_bf16, ref, atol=6e-2, rtol=6e-2), "bf16 path mismatch vs FFT reference"

    # Full-precision path for tight numerical validation of the DFT math.
    out_f32 = fft_layer(x, basis_dtype="float32")
    jax.block_until_ready(out_f32)
    assert jnp.allclose(out_f32, ref, atol=1e-4, rtol=1e-4), "f32 path mismatch vs FFT reference"

    print("KERNEL_OK")
</pallas_src>

<mosaic_0001>
module attributes {stable_mosaic.version = 11 : i64} {
  func.func @dft_power_kernel(%arg0: i32, %arg1: memref<8x128xf32, #tpu.memory_space<vmem>>, %arg2: memref<128x256xbf16, #tpu.memory_space<vmem>>, %arg3: memref<8x128xf32, #tpu.memory_space<vmem>>) attributes {dimension_semantics = [#tpu.dimension_semantics<parallel>], iteration_bounds = array<i64: 1>, scalar_prefetch = 0 : i64, scratch_operands = 0 : i64, tpu.core_type = #tpu.core_type<tc>, window_params = [{transform_indices = @transform_0, window_bounds = array<i64: 8, 128>}, {pipeline_mode = #tpu.pipeline_mode<synchronous>, transform_indices = @transform_1, window_bounds = array<i64: 128, 256>}, {transform_indices = @transform_2, window_bounds = array<i64: 8, 128>}]} {
    %c0 = arith.constant 0 : index
    %c0_0 = arith.constant 0 : index
    %0 = vector.load %arg1[%c0, %c0_0] : memref<8x128xf32, #tpu.memory_space<vmem>>, vector<8x128xf32>
    %1 = arith.truncf %0 : vector<8x128xf32> to vector<8x128xbf16>
    %c0_1 = arith.constant 0 : index
    %c0_2 = arith.constant 0 : index
    %2 = vector.load %arg2[%c0_1, %c0_2] : memref<128x256xbf16, #tpu.memory_space<vmem>>, vector<128x256xbf16>
    %cst = arith.constant dense<0.000000e+00> : vector<8x256xf32>
    %3 = tpu.matmul %1, %2, %cst {dimension_numbers = #tpu.dot_dimension_numbers<[1], [0], [0], [1], [0, 0, 1, 1], [], []>} : vector<8x128xbf16>, vector<128x256xbf16>, vector<8x256xf32> -> vector<8x256xf32>
    %4 = vector.extract_strided_slice %3 {offsets = [0, 0], sizes = [8, 128], strides = [1, 1]} : vector<8x256xf32> to vector<8x128xf32>
    %5 = vector.extract_strided_slice %3 {offsets = [0, 128], sizes = [8, 128], strides = [1, 1]} : vector<8x256xf32> to vector<8x128xf32>
    %6 = arith.mulf %4, %4 : vector<8x128xf32>
    %7 = arith.mulf %5, %5 : vector<8x128xf32>
    %8 = arith.addf %6, %7 : vector<8x128xf32>
    %c0_3 = arith.constant 0 : index
    %c0_4 = arith.constant 0 : index
    %9 = vector.load %arg3[%c0_3, %c0_4] : memref<8x128xf32, #tpu.memory_space<vmem>>, vector<8x128xf32>
    tpu.vector_store %arg3[%c0_3, %c0_4], %8 {strides = array<i32>} : memref<8x128xf32, #tpu.memory_space<vmem>>, vector<8x128xf32>,
    return
  }
  func.func @transform_0(%arg0: i32) -> (i32, i32) {
    %c0_i32 = arith.constant 0 : i32
    %c0_i32_0 = arith.constant 0 : i32
    return %arg0, %c0_i32 : i32, i32
  }
  func.func @transform_1(%arg0: i32) -> (i32, i32) {
    %c0_i32 = arith.constant 0 : i32
    %c0_i32_0 = arith.constant 0 : i32
    %c0_i32_1 = arith.constant 0 : i32
    return %c0_i32, %c0_i32_0 : i32, i32
  }
  func.func @transform_2(%arg0: i32) -> (i32, i32) {
    %c0_i32 = arith.constant 0 : i32
    %c0_i32_0 = arith.constant 0 : i32
    return %arg0, %c0_i32 : i32, i32
  }
}

</mosaic_0001>

<bundles_post_ra>
// kernel: tpu_custom_call.1
= control target key start
LH: loop header
LB: loop body
LE: loop exit
PB: predicated region body
PF: predicated region fallthrough
CT: control target
= control target key end

     0   :  { %7 = vsyncpa [#allocation3], 0  ;;  %s380_s0 = inlined_call_operand.hbm [shape: f32[8,128], index: 0, kind: input, shape index: {}]   ;;  %s381_s1 = inlined_call_operand.hbm [shape: bf16[128,256], index: 1, kind: input, shape index: {}]   ;;  %s382_s2 = inlined_call_operand.hbm [shape: f32[8,128], index: 2, kind: output, shape index: {}]  }
   0x1   :  { %8 = vsyncpa [#allocation6], 0 }
   0x2   :  { %9 = vsyncpa [#allocation4], 0  ;;  %s316_s9 = smov [#allocation2]   ;;  %s317_s11 = smov [#allocation5]  }
   0x3   :  { %s16_s10 = sshll.u32 %s316_s9, 4  ;;  %s25_s12 = sshll.u32 %s317_s11, 4  ;;  %s17_s10 = int_to_ptr.vmem [resolvable:$true] %s16_s10  ;;  %s337_s12 = int_to_ptr.vmem [resolvable:$true] %s25_s12 }
   0x4   :  { %s244_s15 = scalar_lea.hbm %s380_s0, 128 }
   0x5   :  { %p245_p0 = scmp.ne.s32.totalorder %s380_s0, %s244_s15  ;;  %p248_p1 = scmp.lt.u32.totalorder %s244_s15, %s380_s0 }
   0x7   :  { %p250_p2 = pnand %p248_p1, %p245_p0 }
   0x9   :  { %253 = shalt.err (!%p250_p2)
}
   0xa   :  { %s254_s20 = scalar_lea.vmem %s17_s10, 128  ;;  %p259_p4 = scmp.lt.s32.totalorder %s17_s10, %s17_s10 }
   0xb   :  { %p255_p3 = scmp.ne.s32.totalorder %s17_s10, %s254_s20  ;;  %p260_p5 = scmp.lt.s32.totalorder %s254_s20, %s254_s20 }
   0xd   :  { %p261_p6 = por %p260_p5, %p259_p4 }
   0xf   :  { %p262_p7 = pnand %p261_p6, %p255_p3 }
  0x11   :  { %265 = shalt.err (!%p262_p7)
}
  0x12   :  { %19 = dma.hbm_to_vmem [thread:$0]  %s380_s0, 128, %s17_s10, [#allocation3]  }
  0x13   :  { %s266_s25 = scalar_lea.hbm %s381_s1, 2048 }
  0x14   :  { %p267_p8 = scmp.ne.s32.totalorder %s381_s1, %s266_s25  ;;  %p270_p9 = scmp.lt.u32.totalorder %s266_s25, %s381_s1 }
  0x16   :  { %p272_p10 = pnand %p270_p9, %p267_p8 }
  0x18   :  { %275 = shalt.err (!%p272_p10)
}
  0x19   :  { %s276_s30 = scalar_lea.vmem %s337_s12, 2048  ;;  %p281_p12 = scmp.lt.s32.totalorder %s337_s12, %s337_s12 }
  0x1a   :  { %p277_p11 = scmp.ne.s32.totalorder %s337_s12, %s276_s30  ;;  %p282_p13 = scmp.lt.s32.totalorder %s276_s30, %s276_s30 }
  0x1c   :  { %p283_p0 = por %p282_p13, %p281_p12 }
  0x1e   :  { %p284_p1 = pnand %p283_p0, %p277_p11 }
  0x20   :  { %287 = shalt.err (!%p284_p1)
}
  0x21   :  { %s318_s0 = smov 128   ;;  %s319_s3 = smov 8  }
  0x22   :  { %31 = dma.hbm_to_vmem [thread:$0]  %s381_s1, 2048, %s337_s12, [#allocation6], %s318_s0, %s318_s0, %s319_s3  }
  0x23   :  { %310 = dma.done.wait [#allocation3], 128  }
  0x24   :  { %311 = vsyncadd [#allocation3], 4294967168 }
  0x25   :  { %312 = dma.done.wait [#allocation6], 2048  }
  0x26   :  { %313 = vsyncadd [#allocation6], 4294965248  ;;  %v320_v0 = vmov 0   ;;  %v220_v1 = vld [vmem:[#allocation5 + $0x4] ss:$8 sps:$4 sm:$0xff]   ;;  %v39_v17 = vld [vmem:[#allocation2] sm:$0xff] }
  0x27   :  { %169 = vmatprep.mubr.bf16.mxu0 %v320_v0  ;;  %v222_v2 = vld [vmem:[#allocation5] ss:$8 sps:$4 sm:$0xff]   ;;  %137 = vmatprep.subr.bf16.mxu0 %v220_v1  ;;  %v223_v3 = vld [vmem:[#allocation5 + $0x14] ss:$8 sps:$4 sm:$0xff]   ;;  %v225_v4 = vld [vmem:[#allocation5 + $0x10] ss:$8 sps:$4 sm:$0xff]   ;;  %v40_v18 = vpack.c.bf16 %v39_v17, %v39_v17 }
  0x28   :  { %138 = vmatpush1.bf16.msra.mxu0 %v222_v2  ;;  %v226_v5 = vld [vmem:[#allocation5 + $0x24] ss:$8 sps:$4 sm:$0xff]   ;;  %v228_v6 = vld [vmem:[#allocation5 + $0x20] ss:$8 sps:$4 sm:$0xff]   ;;  %v229_v7 = vld [vmem:[#allocation5 + $0x34] ss:$8 sps:$4 sm:$0xff]  }
  0x29   :  { %139 = vmatprep.subr.bf16.mxu0 %v223_v3  ;;  %v231_v8 = vld [vmem:[#allocation5 + $0x30] ss:$8 sps:$4 sm:$0xff]   ;;  %v232_v9 = vld [vmem:[#allocation5 + $0x44] ss:$8 sps:$4 sm:$0xff]   ;;  %v234_v10 = vld [vmem:[#allocation5 + $0x40] ss:$8 sps:$4 sm:$0xff]  }
  0x2a   :  { %v235_v11 = vld [vmem:[#allocation5 + $0x54] ss:$8 sps:$4 sm:$0xff]   ;;  %v237_v12 = vld [vmem:[#allocation5 + $0x50] ss:$8 sps:$4 sm:$0xff]   ;;  %v238_v13 = vld [vmem:[#allocation5 + $0x64] ss:$8 sps:$4 sm:$0xff]  }
  0x2b   :  { %v240_v14 = vld [vmem:[#allocation5 + $0x60] ss:$8 sps:$4 sm:$0xff]   ;;  %v241_v15 = vld [vmem:[#allocation5 + $0x74] ss:$8 sps:$4 sm:$0xff]   ;;  %v243_v16 = vld [vmem:[#allocation5 + $0x70] ss:$8 sps:$4 sm:$0xff]  }
  0x2c   :  { %140 = vmatpush1.bf16.msra.mxu0 %v225_v4  ;;  %s321_s1 = smov [#allocation7]  }
  0x2d   :  { %141 = vmatprep.subr.bf16.mxu0 %v226_v5  ;;  %s188_s6 = sshll.u32 %s321_s1, 4  ;;  %s189_s6 = int_to_ptr.vmem [resolvable:$true] %s188_s6 }
  0x2e   :  { %s288_s7 = scalar_lea.vmem %s189_s6, 128  ;;  %p293_p3 = scmp.lt.s32.totalorder %s189_s6, %s189_s6 }
  0x2f   :  { %p289_p2 = scmp.ne.s32.totalorder %s189_s6, %s288_s7  ;;  %p294_p4 = scmp.lt.s32.totalorder %s288_s7, %s288_s7 }
  0x30   :  { %142 = vmatpush1.bf16.msra.mxu0 %v228_v6 }
  0x31   :  { %143 = vmatprep.subr.bf16.mxu0 %v229_v7  ;;  %p295_p5 = por %p294_p4, %p293_p3 }
  0x33   :  { %p296_p6 = pnand %p295_p5, %p289_p2 }
  0x34   :  { %144 = vmatpush1.bf16.msra.mxu0 %v231_v8 }
  0x35   :  { %145 = vmatprep.subr.bf16.mxu0 %v232_v9 }
  0x38   :  { %146 = vmatpush1.bf16.msra.mxu0 %v234_v10 }
  0x39   :  { %147 = vmatprep.subr.bf16.mxu0 %v235_v11 }
  0x3c   :  { %148 = vmatpush1.bf16.msra.mxu0 %v237_v12 }
  0x3d   :  { %149 = vmatprep.subr.bf16.mxu0 %v238_v13 }
  0x40   :  { %150 = vmatpush1.bf16.msra.mxu0 %v240_v14 }
  0x41   :  { %151 = vmatprep.subr.bf16.mxu0 %v241_v15 }
  0x44   :  { %152 = vmatpush1.bf16.msra.mxu0 %v243_v16 }
  0x47   :  { %170 = vmatmul.mubr.bf16.vlgmr.msra.gmra.mrb[0].mxu0 %v40_v18 }
 0x11a   :  { %v171_v19 = vpop.f32.mrb[0].mxu0 }
 0x11b   :  { %v178_v20 = vmul.f32 %v171_v19, %v171_v19  ;;  %v173_v21 = vpop.f32.mrb[1].mxu0 }
 0x11c   :  { %v179_v22 = vmul.f32 %v173_v21, %v173_v21  ;;  %v175_v23 = vpop.f32.mrb[2].mxu0 }
 0x11d   :  { %v176_v24 = vpop.f32.mrb[3].mxu0 }
 0x11e   :  { %v180_v25 = vadd.f32 %v179_v22, %v178_v20 }
 0x120   :  { %181 = vst [vmem:[#allocation7] sm:$0xff] %v180_v25 }
 0x121   :  { %299 = shalt.err (!%p296_p6)
}
 0x122   :  { %s300_s10 = scalar_lea.hbm %s382_s2, 128 }
 0x123   :  { %p301_p7 = scmp.ne.s32.totalorder %s382_s2, %s300_s10  ;;  %p304_p8 = scmp.lt.u32.totalorder %s300_s10, %s382_s2 }
 0x125   :  { %p306_p9 = pnand %p304_p8, %p301_p7 }
 0x127   :  { %309 = shalt.err (!%p306_p9)
}
 0x128   :  { %191 = dma.vmem_to_hbm [thread:$0]  %s189_s6, 128, %s382_s2, [#allocation4]  }
 0x129   :  { %314 = dma.done.wait [#allocation4], 128  }
 0x12a   :  { %315 = vsyncadd [#allocation4], 4294967168 }
 0x12b   :  { %195 = vsyncpa [#allocation3], 1 }
 0x12c   :  { %196 = vsyncpa [#allocation6], 1 }
 0x12d   :  { %197 = vsyncpa [#allocation4], 1 }

</bundles_post_ra>
